<compile_context>
chip_gen: v7x
topology: tpu7x:2x2x1
jax: 0.10.0
libtpu: 0.0.40
codegen_flags: <defaults>
</compile_context>

<pallas_src>
import jax
import jax.numpy as jnp
from jax.experimental import pallas as pl
from jax.experimental.pallas import tpu as pltpu


# Tap order t = (dh+1)*3 + (dw+1), matching the (9, c2, c1) weight packing.
_TAPS = tuple((dh, dw) for dh in (-1, 0, 1) for dw in (-1, 0, 1))


def fold_params(params):
    """Fold BatchNorm scale into the conv weights (f32 math, bf16 storage).

    Returns:
      w1f: (c1, Cin) bf16     b1: (c1,) f32
      w2f: (9, c2, c1) bf16   b2: (c2,) f32
      w3f: (c3, c2) bf16      b3: (c3,) f32
    """
    w1, s1, b1, w2, s2, b2, w3, s3, b3 = params
    f32 = jnp.float32
    w1f = (w1.astype(f32).T * s1[:, None]).astype(jnp.bfloat16)          # (c1, Cin)
    c1 = w2.shape[2]
    c2 = w2.shape[3]
    w2p = jnp.transpose(w2.astype(f32), (0, 1, 3, 2))                     # (3,3,c2,c1)
    w2f = (w2p * s2[None, None, :, None]).reshape(9, c2, c1).astype(jnp.bfloat16)
    w3f = (w3.astype(f32).T * s3[:, None]).astype(jnp.bfloat16)          # (c3, c2)
    return w1f, b1.astype(f32), w2f, b2.astype(f32), w3f, b3.astype(f32)


def _edge_masks(H, W, batch_tile):
    """(9, batch_tile*H*W) f32 {0,1} masks: 1 where tap (dh,dw) stays in-image."""
    HW = H * W
    pix = jnp.arange(HW, dtype=jnp.int32)
    hh = pix // W
    ww = pix % W
    rows = []
    for dh, dw in _TAPS:
        m = jnp.ones((HW,), dtype=bool)
        if dh == -1:
            m = m & (hh >= 1)
        elif dh == 1:
            m = m & (hh <= H - 2)
        if dw == -1:
            m = m & (ww >= 1)
        elif dw == 1:
            m = m & (ww <= W - 2)
        rows.append(m.astype(jnp.float32))
    masks = jnp.stack(rows, axis=0)                                      # (9, HW)
    return jnp.tile(masks, (1, batch_tile))                              # (9, N)


def fadc_forward(x, params, batch_tile=None):
    """x: (B, Cin, H, W) float32 (NCHW, like PyTorch). Returns (B, c3, H, W) f32."""
    B, Cin, H, W = x.shape
    HW = H * W

    w1f, b1, w2f, b2, w3f, b3 = fold_params(params)
    c1 = w1f.shape[0]
    c2 = w2f.shape[1]
    c3 = w3f.shape[0]
    assert c3 == Cin, "residual add requires filters[2] == in_channel"

    # Fuse enough images per grid step to get a lane-dense (>=512 lane) slab.
    if batch_tile is None:
        batch_tile = B
        for bt in range(1, B + 1):
            if B % bt == 0 and bt * HW >= 512:
                batch_tile = bt
                break
    assert B % batch_tile == 0
    n_steps = B // batch_tile
    N = batch_tile * HW

    masks = _edge_masks(H, W, batch_tile)                                # (9, N) f32
    b1k = b1.reshape(c1, 1)
    b2k = b2.reshape(c2, 1)
    b3k = b3.reshape(c3, 1)

    # (B, Cin, H, W) -> (n_steps, Cin, batch_tile*HW); images contiguous on lanes.
    x_steps = (x.reshape(n_steps, batch_tile, Cin, HW)
                .transpose(0, 2, 1, 3)
                .reshape(n_steps, Cin, N))

    def kernel(x_ref, w1_ref, b1_ref, w2_ref, b2_ref, w3_ref, b3_ref, m_ref,
               out_ref):
        # ---- 1x1 conv (Cin -> c1), folded-BN bias, ReLU ----------------------
        x_bf = x_ref[...].astype(jnp.bfloat16)                           # (Cin, N)
        h1 = jnp.dot(w1_ref[...], x_bf,
                     preferred_element_type=jnp.float32)                 # (c1, N)
        h1 = jnp.maximum(h1 + b1_ref[...], 0.0)

        # ---- 3x3, stride 1, pad 1 (c1 -> c2): 9 accumulated MXU matmuls ------
        # The lane roll wraps across image boundaries inside the fused slab; the
        # precomputed masks zero exactly those lanes (and the zero-pad ring).
        h2 = None
        for t, (dh, dw) in enumerate(_TAPS):
            if dh == 0 and dw == 0:
                shifted = h1
            else:
                delta = dh * W + dw
                shifted = pltpu.roll(h1, (-delta) % N, axis=1)           # XLU roll
                shifted = shifted * m_ref[t:t + 1, :]                    # f32 mask
            part = jnp.dot(w2_ref[t], shifted.astype(jnp.bfloat16),
                           preferred_element_type=jnp.float32)           # (c2, N)
            h2 = part if h2 is None else h2 + part
        h2 = jnp.maximum(h2 + b2_ref[...], 0.0)

        # ---- 1x1 conv (c2 -> c3), folded-BN bias, ReLU -----------------------
        h3 = jnp.dot(w3_ref[...], h2.astype(jnp.bfloat16),
                     preferred_element_type=jnp.float32)                 # (c3, N)
        h3 = jnp.maximum(h3 + b3_ref[...], 0.0)

        # ---- residual add + final ReLU ----------------------------------------
        out_ref[...] = jnp.maximum(
            x_ref[...].astype(jnp.float32) + h3, 0.0).astype(out_ref.dtype)

    def full(a):
        return pl.BlockSpec(a.shape, lambda i, n=a.ndim: (0,) * n)

    out = pl.pallas_call(
        kernel,
        out_shape=jax.ShapeDtypeStruct((n_steps, c3, N), x.dtype),
        grid_spec=pltpu.PrefetchScalarGridSpec(
            num_scalar_prefetch=0,
            grid=(n_steps,),
            in_specs=[
                pl.BlockSpec((None, Cin, N), lambda i: (i, 0, 0)),
                full(w1f), full(b1k),
                full(w2f), full(b2k),
                full(w3f), full(b3k),
                full(masks),
            ],
            out_specs=pl.BlockSpec((None, c3, N), lambda i: (i, 0, 0)),
        ),
        compiler_params=pltpu.CompilerParams(
            dimension_semantics=("parallel",)),
    )(x_steps, w1f, b1k, w2f, b2k, w3f, b3k, masks)

    return (out.reshape(n_steps, c3, batch_tile, HW)
               .transpose(0, 2, 1, 3)
               .reshape(B, c3, H, W))


def fadc_ref(x, params):
    """Pure-JAX reference.

    Every contraction is f32 x f32 with operands pre-rounded to bf16, which (a)
    matches the kernel's bf16-operand / f32-accumulate MXU math and (b) avoids
    bf16 x bf16 -> f32 dots that the CPU DotThunk cannot execute.
    """
    w1f, b1, w2f, b2, w3f, b3 = fold_params(params)
    f32 = jnp.float32
    bf = lambda a: a.astype(jnp.bfloat16).astype(f32)
    c2, c1 = w2f.shape[1], w2f.shape[2]

    h = jnp.einsum('oc,bchw->bohw', w1f.astype(f32), bf(x))
    h = jax.nn.relu(h + b1[None, :, None, None])

    w2_hwio = jnp.transpose(w2f.astype(f32).reshape(3, 3, c2, c1), (0, 1, 3, 2))
    h = jax.lax.conv_general_dilated(
        bf(h), w2_hwio, window_strides=(1, 1), padding='SAME',
        dimension_numbers=('NCHW', 'HWIO', 'NCHW'))
    h = jax.nn.relu(h + b2[None, :, None, None])

    h = jnp.einsum('oc,bchw->bohw', w3f.astype(f32), bf(h))
    h = jax.nn.relu(h + b3[None, :, None, None])
    return jax.nn.relu(x + h)


if __name__ == "__main__":
    key = jax.random.PRNGKey(0)
    B, H, W = 2, 16, 16
    in_channel = 4
    c1, c2, c3 = 8, 8, 4      # filters; c3 == in_channel so the residual add is valid

    ks = jax.random.split(key, 16)
    x = jax.random.normal(ks[0], (B, in_channel, H, W), jnp.float32)      # NCHW

    def bn_fold(kg, kb, km, kv, c):
        gamma = 1.0 + 0.1 * jax.random.normal(kg, (c,), jnp.float32)
        beta = 0.1 * jax.random.normal(kb, (c,), jnp.float32)
        mean = 0.1 * jax.random.normal(km, (c,), jnp.float32)
        var = jnp.abs(jax.random.normal(kv, (c,), jnp.float32)) + 0.5
        scale = gamma * jax.lax.rsqrt(var + 1e-5)
        bias = beta - mean * scale
        return scale, bias

    # Raw conv weights kept in f32; BN scale is folded in f32 and the folded
    # weights are stored bf16 (done identically for kernel and reference).
    w1 = 0.2 * jax.random.normal(ks[1], (in_channel, c1), jnp.float32)
    s1, b1 = bn_fold(ks[2], ks[3], ks[4], ks[5], c1)
    w2 = 0.2 * jax.random.normal(ks[6], (3, 3, c1, c2), jnp.float32)      # HWIO
    s2, b2 = bn_fold(ks[7], ks[8], ks[9], ks[10], c2)
    w3 = 0.2 * jax.random.normal(ks[11], (c2, c3), jnp.float32)
    s3, b3 = bn_fold(ks[12], ks[13], ks[14], ks[15], c3)

    params = (w1, s1, b1, w2, s2, b2, w3, s3, b3)

    out = fadc_forward(x, params)
    out = jax.block_until_ready(out)

    ref = fadc_ref(x, params)
    ref = jax.block_until_ready(ref)

    assert out.shape == (B, c3, H, W) and out.dtype == jnp.float32

    # Tolerance accounts for MXU-vs-CPU f32 accumulation-order differences that
    # can occasionally double-round across a bf16 boundary at the stage casts;
    # structural bugs (wrong tap/mask/weight mapping) would show errors ~O(0.1+).
    err_max = float(jnp.max(jnp.abs(out - ref)))
    err_mean = float(jnp.mean(jnp.abs(out - ref)))
    assert err_max < 5e-3, f"max abs err {err_max}"
    assert err_mean < 1e-4, f"mean abs err {err_mean}"

    print("KERNEL_OK")
</pallas_src>

<mosaic_0001>
module attributes {stable_mosaic.version = 11 : i64} {
  func.func @kernel(%arg0: i32, %arg1: memref<1x4x512xf32, #tpu.memory_space<vmem>>, %arg2: memref<8x4xbf16, #tpu.memory_space<vmem>>, %arg3: memref<8x1xf32, #tpu.memory_space<vmem>>, %arg4: memref<9x8x8xbf16, #tpu.memory_space<vmem>>, %arg5: memref<8x1xf32, #tpu.memory_space<vmem>>, %arg6: memref<4x8xbf16, #tpu.memory_space<vmem>>, %arg7: memref<4x1xf32, #tpu.memory_space<vmem>>, %arg8: memref<9x512xf32, #tpu.memory_space<vmem>>, %arg9: memref<1x4x512xf32, #tpu.memory_space<vmem>>) attributes {dimension_semantics = [#tpu.dimension_semantics<parallel>], iteration_bounds = array<i64: 1>, scalar_prefetch = 0 : i64, scratch_operands = 0 : i64, tpu.core_type = #tpu.core_type<tc>, window_params = [{transform_indices = @transform_0, window_bounds = array<i64: 1, 4, 512>}, {pipeline_mode = #tpu.pipeline_mode<synchronous>, transform_indices = @transform_1, window_bounds = array<i64: 8, 4>}, {pipeline_mode = #tpu.pipeline_mode<synchronous>, transform_indices = @transform_2, window_bounds = array<i64: 8, 1>}, {pipeline_mode = #tpu.pipeline_mode<synchronous>, transform_indices = @transform_3, window_bounds = array<i64: 9, 8, 8>}, {pipeline_mode = #tpu.pipeline_mode<synchronous>, transform_indices = @transform_4, window_bounds = array<i64: 8, 1>}, {pipeline_mode = #tpu.pipeline_mode<synchronous>, transform_indices = @transform_5, window_bounds = array<i64: 4, 8>}, {pipeline_mode = #tpu.pipeline_mode<synchronous>, transform_indices = @transform_6, window_bounds = array<i64: 4, 1>}, {pipeline_mode = #tpu.pipeline_mode<synchronous>, transform_indices = @transform_7, window_bounds = array<i64: 9, 512>}, {transform_indices = @transform_8, window_bounds = array<i64: 1, 4, 512>}]} {
    %c0 = arith.constant 0 : index
    %c0_0 = arith.constant 0 : index
    %c0_1 = arith.constant 0 : index
    %0 = vector.load %arg1[%c0, %c0_0, %c0_1] : memref<1x4x512xf32, #tpu.memory_space<vmem>>, vector<1x4x512xf32>
    %1 = vector.shape_cast %0 : vector<1x4x512xf32> to vector<4x512xf32>
    %2 = arith.truncf %1 : vector<4x512xf32> to vector<4x512xbf16>
    %c0_2 = arith.constant 0 : index
    %c0_3 = arith.constant 0 : index
    %3 = vector.load %arg2[%c0_2, %c0_3] : memref<8x4xbf16, #tpu.memory_space<vmem>>, vector<8x4xbf16>
    %cst = arith.constant dense<0.000000e+00> : vector<8x512xf32>
    %4 = tpu.matmul %3, %2, %cst {dimension_numbers = #tpu.dot_dimension_numbers<[1], [0], [0], [1], [0, 0, 1, 1], [], []>} : vector<8x4xbf16>, vector<4x512xbf16>, vector<8x512xf32> -> vector<8x512xf32>
    %c0_4 = arith.constant 0 : index
    %c0_5 = arith.constant 0 : index
    %5 = vector.load %arg3[%c0_4, %c0_5] : memref<8x1xf32, #tpu.memory_space<vmem>>, vector<8x1xf32>
    %6 = vector.broadcast %5 : vector<8x1xf32> to vector<8x512xf32>
    %7 = arith.addf %4, %6 : vector<8x512xf32>
    %cst_6 = arith.constant 0.000000e+00 : f32
    %8 = vector.broadcast %cst_6 : f32 to vector<8x512xf32>
    %9 = arith.maximumf %7, %8 : vector<8x512xf32>
    %c17_i32 = arith.constant 17 : i32
    %10 = tpu.dynamic_rotate %9 by %c17_i32 dim 1 : vector<8x512xf32>, i32 -> vector<8x512xf32>
    %c0_7 = arith.constant 0 : index
    %c0_8 = arith.constant 0 : index
    %11 = vector.load %arg8[%c0_7, %c0_8] : memref<9x512xf32, #tpu.memory_space<vmem>>, vector<1x512xf32>
    %12 = vector.broadcast %11 : vector<1x512xf32> to vector<8x512xf32>
    %13 = arith.mulf %10, %12 : vector<8x512xf32>
    %c0_9 = arith.constant 0 : index
    %c0_10 = arith.constant 0 : index
    %c0_11 = arith.constant 0 : index
    %14 = vector.load %arg4[%c0_9, %c0_10, %c0_11] : memref<9x8x8xbf16, #tpu.memory_space<vmem>>, vector<1x8x8xbf16>
    %15 = vector.shape_cast %14 : vector<1x8x8xbf16> to vector<8x8xbf16>
    %16 = arith.truncf %13 : vector<8x512xf32> to vector<8x512xbf16>
    %cst_12 = arith.constant dense<0.000000e+00> : vector<8x512xf32>
    %17 = tpu.matmul %15, %16, %cst_12 {dimension_numbers = #tpu.dot_dimension_numbers<[1], [0], [0], [1], [0, 0, 1, 1], [], []>} : vector<8x8xbf16>, vector<8x512xbf16>, vector<8x512xf32> -> vector<8x512xf32>
    %c16_i32 = arith.constant 16 : i32
    %18 = tpu.dynamic_rotate %9 by %c16_i32 dim 1 : vector<8x512xf32>, i32 -> vector<8x512xf32>
    %c1 = arith.constant 1 : index
    %c0_13 = arith.constant 0 : index
    %19 = vector.load %arg8[%c1, %c0_13] : memref<9x512xf32, #tpu.memory_space<vmem>>, vector<1x512xf32>
    %20 = vector.broadcast %19 : vector<1x512xf32> to vector<8x512xf32>
    %21 = arith.mulf %18, %20 : vector<8x512xf32>
    %c1_14 = arith.constant 1 : index
    %c0_15 = arith.constant 0 : index
    %c0_16 = arith.constant 0 : index
    %22 = vector.load %arg4[%c1_14, %c0_15, %c0_16] : memref<9x8x8xbf16, #tpu.memory_space<vmem>>, vector<1x8x8xbf16>
    %23 = vector.shape_cast %22 : vector<1x8x8xbf16> to vector<8x8xbf16>
    %24 = arith.truncf %21 : vector<8x512xf32> to vector<8x512xbf16>
    %cst_17 = arith.constant dense<0.000000e+00> : vector<8x512xf32>
    %25 = tpu.matmul %23, %24, %cst_17 {dimension_numbers = #tpu.dot_dimension_numbers<[1], [0], [0], [1], [0, 0, 1, 1], [], []>} : vector<8x8xbf16>, vector<8x512xbf16>, vector<8x512xf32> -> vector<8x512xf32>
    %26 = arith.addf %17, %25 : vector<8x512xf32>
    %c15_i32 = arith.constant 15 : i32
    %27 = tpu.dynamic_rotate %9 by %c15_i32 dim 1 : vector<8x512xf32>, i32 -> vector<8x512xf32>
    %c2 = arith.constant 2 : index
    %c0_18 = arith.constant 0 : index
    %28 = vector.load %arg8[%c2, %c0_18] : memref<9x512xf32, #tpu.memory_space<vmem>>, vector<1x512xf32>
    %29 = vector.broadcast %28 : vector<1x512xf32> to vector<8x512xf32>
    %30 = arith.mulf %27, %29 : vector<8x512xf32>
    %c2_19 = arith.constant 2 : index
    %c0_20 = arith.constant 0 : index
    %c0_21 = arith.constant 0 : index
    %31 = vector.load %arg4[%c2_19, %c0_20, %c0_21] : memref<9x8x8xbf16, #tpu.memory_space<vmem>>, vector<1x8x8xbf16>
    %32 = vector.shape_cast %31 : vector<1x8x8xbf16> to vector<8x8xbf16>
    %33 = arith.truncf %30 : vector<8x512xf32> to vector<8x512xbf16>
    %cst_22 = arith.constant dense<0.000000e+00> : vector<8x512xf32>
    %34 = tpu.matmul %32, %33, %cst_22 {dimension_numbers = #tpu.dot_dimension_numbers<[1], [0], [0], [1], [0, 0, 1, 1], [], []>} : vector<8x8xbf16>, vector<8x512xbf16>, vector<8x512xf32> -> vector<8x512xf32>
    %35 = arith.addf %26, %34 : vector<8x512xf32>
    %c1_i32 = arith.constant 1 : i32
    %36 = tpu.dynamic_rotate %9 by %c1_i32 dim 1 : vector<8x512xf32>, i32 -> vector<8x512xf32>
    %c3 = arith.constant 3 : index
    %c0_23 = arith.constant 0 : index
    %37 = vector.load %arg8[%c3, %c0_23] : memref<9x512xf32, #tpu.memory_space<vmem>>, vector<1x512xf32>
    %38 = vector.broadcast %37 : vector<1x512xf32> to vector<8x512xf32>
    %39 = arith.mulf %36, %38 : vector<8x512xf32>
    %c3_24 = arith.constant 3 : index
    %c0_25 = arith.constant 0 : index
    %c0_26 = arith.constant 0 : index
    %40 = vector.load %arg4[%c3_24, %c0_25, %c0_26] : memref<9x8x8xbf16, #tpu.memory_space<vmem>>, vector<1x8x8xbf16>
    %41 = vector.shape_cast %40 : vector<1x8x8xbf16> to vector<8x8xbf16>
    %42 = arith.truncf %39 : vector<8x512xf32> to vector<8x512xbf16>
    %cst_27 = arith.constant dense<0.000000e+00> : vector<8x512xf32>
    %43 = tpu.matmul %41, %42, %cst_27 {dimension_numbers = #tpu.dot_dimension_numbers<[1], [0], [0], [1], [0, 0, 1, 1], [], []>} : vector<8x8xbf16>, vector<8x512xbf16>, vector<8x512xf32> -> vector<8x512xf32>
    %44 = arith.addf %35, %43 : vector<8x512xf32>
    %c4 = arith.constant 4 : index
    %c0_28 = arith.constant 0 : index
    %c0_29 = arith.constant 0 : index
    %45 = vector.load %arg4[%c4, %c0_28, %c0_29] : memref<9x8x8xbf16, #tpu.memory_space<vmem>>, vector<1x8x8xbf16>
    %46 = vector.shape_cast %45 : vector<1x8x8xbf16> to vector<8x8xbf16>
    %47 = arith.truncf %9 : vector<8x512xf32> to vector<8x512xbf16>
    %cst_30 = arith.constant dense<0.000000e+00> : vector<8x512xf32>
    %48 = tpu.matmul %46, %47, %cst_30 {dimension_numbers = #tpu.dot_dimension_numbers<[1], [0], [0], [1], [0, 0, 1, 1], [], []>} : vector<8x8xbf16>, vector<8x512xbf16>, vector<8x512xf32> -> vector<8x512xf32>
    %49 = arith.addf %44, %48 : vector<8x512xf32>
    %c511_i32 = arith.constant 511 : i32
    %50 = tpu.dynamic_rotate %9 by %c511_i32 dim 1 : vector<8x512xf32>, i32 -> vector<8x512xf32>
    %c5 = arith.constant 5 : index
    %c0_31 = arith.constant 0 : index
    %51 = vector.load %arg8[%c5, %c0_31] : memref<9x512xf32, #tpu.memory_space<vmem>>, vector<1x512xf32>
    %52 = vector.broadcast %51 : vector<1x512xf32> to vector<8x512xf32>
    %53 = arith.mulf %50, %52 : vector<8x512xf32>
    %c5_32 = arith.constant 5 : index
    %c0_33 = arith.constant 0 : index
    %c0_34 = arith.constant 0 : index
    %54 = vector.load %arg4[%c5_32, %c0_33, %c0_34] : memref<9x8x8xbf16, #tpu.memory_space<vmem>>, vector<1x8x8xbf16>
    %55 = vector.shape_cast %54 : vector<1x8x8xbf16> to vector<8x8xbf16>
    %56 = arith.truncf %53 : vector<8x512xf32> to vector<8x512xbf16>
    %cst_35 = arith.constant dense<0.000000e+00> : vector<8x512xf32>
    %57 = tpu.matmul %55, %56, %cst_35 {dimension_numbers = #tpu.dot_dimension_numbers<[1], [0], [0], [1], [0, 0, 1, 1], [], []>} : vector<8x8xbf16>, vector<8x512xbf16>, vector<8x512xf32> -> vector<8x512xf32>
    %58 = arith.addf %49, %57 : vector<8x512xf32>
    %c497_i32 = arith.constant 497 : i32
    %59 = tpu.dynamic_rotate %9 by %c497_i32 dim 1 : vector<8x512xf32>, i32 -> vector<8x512xf32>
    %c6 = arith.constant 6 : index
    %c0_36 = arith.constant 0 : index
    %60 = vector.load %arg8[%c6, %c0_36] : memref<9x512xf32, #tpu.memory_space<vmem>>, vector<1x512xf32>
    %61 = vector.broadcast %60 : vector<1x512xf32> to vector<8x512xf32>
    %62 = arith.mulf %59, %61 : vector<8x512xf32>
    %c6_37 = arith.constant 6 : index
    %c0_38 = arith.constant 0 : index
    %c0_39 = arith.constant 0 : index
    %63 = vector.load %arg4[%c6_37, %c0_38, %c0_39] : memref<9x8x8xbf16, #tpu.memory_space<vmem>>, vector<1x8x8xbf16>
    %64 = vector.shape_cast %63 : vector<1x8x8xbf16> to vector<8x8xbf16>
    %65 = arith.truncf %62 : vector<8x512xf32> to vector<8x512xbf16>
    %cst_40 = arith.constant dense<0.000000e+00> : vector<8x512xf32>
    %66 = tpu.matmul %64, %65, %cst_40 {dimension_numbers = #tpu.dot_dimension_numbers<[1], [0], [0], [1], [0, 0, 1, 1], [], []>} : vector<8x8xbf16>, vector<8x512xbf16>, vector<8x512xf32> -> vector<8x512xf32>
    %67 = arith.addf %58, %66 : vector<8x512xf32>
    %c496_i32 = arith.constant 496 : i32
    %68 = tpu.dynamic_rotate %9 by %c496_i32 dim 1 : vector<8x512xf32>, i32 -> vector<8x512xf32>
    %c7 = arith.constant 7 : index
    %c0_41 = arith.constant 0 : index
    %69 = vector.load %arg8[%c7, %c0_41] : memref<9x512xf32, #tpu.memory_space<vmem>>, vector<1x512xf32>
    %70 = vector.broadcast %69 : vector<1x512xf32> to vector<8x512xf32>
    %71 = arith.mulf %68, %70 : vector<8x512xf32>
    %c7_42 = arith.constant 7 : index
    %c0_43 = arith.constant 0 : index
    %c0_44 = arith.constant 0 : index
    %72 = vector.load %arg4[%c7_42, %c0_43, %c0_44] : memref<9x8x8xbf16, #tpu.memory_space<vmem>>, vector<1x8x8xbf16>
    %73 = vector.shape_cast %72 : vector<1x8x8xbf16> to vector<8x8xbf16>
    %74 = arith.truncf %71 : vector<8x512xf32> to vector<8x512xbf16>
    %cst_45 = arith.constant dense<0.000000e+00> : vector<8x512xf32>
    %75 = tpu.matmul %73, %74, %cst_45 {dimension_numbers = #tpu.dot_dimension_numbers<[1], [0], [0], [1], [0, 0, 1, 1], [], []>} : vector<8x8xbf16>, vector<8x512xbf16>, vector<8x512xf32> -> vector<8x512xf32>
    %76 = arith.addf %67, %75 : vector<8x512xf32>
    %c495_i32 = arith.constant 495 : i32
    %77 = tpu.dynamic_rotate %9 by %c495_i32 dim 1 : vector<8x512xf32>, i32 -> vector<8x512xf32>
    %c8 = arith.constant 8 : index
    %c0_46 = arith.constant 0 : index
    %78 = vector.load %arg8[%c8, %c0_46] : memref<9x512xf32, #tpu.memory_space<vmem>>, vector<1x512xf32>
    %79 = vector.broadcast %78 : vector<1x512xf32> to vector<8x512xf32>
    %80 = arith.mulf %77, %79 : vector<8x512xf32>
    %c8_47 = arith.constant 8 : index
    %c0_48 = arith.constant 0 : index
    %c0_49 = arith.constant 0 : index
    %81 = vector.load %arg4[%c8_47, %c0_48, %c0_49] : memref<9x8x8xbf16, #tpu.memory_space<vmem>>, vector<1x8x8xbf16>
    %82 = vector.shape_cast %81 : vector<1x8x8xbf16> to vector<8x8xbf16>
    %83 = arith.truncf %80 : vector<8x512xf32> to vector<8x512xbf16>
    %cst_50 = arith.constant dense<0.000000e+00> : vector<8x512xf32>
    %84 = tpu.matmul %82, %83, %cst_50 {dimension_numbers = #tpu.dot_dimension_numbers<[1], [0], [0], [1], [0, 0, 1, 1], [], []>} : vector<8x8xbf16>, vector<8x512xbf16>, vector<8x512xf32> -> vector<8x512xf32>
    %85 = arith.addf %76, %84 : vector<8x512xf32>
    %c0_51 = arith.constant 0 : index
    %c0_52 = arith.constant 0 : index
    %86 = vector.load %arg5[%c0_51, %c0_52] : memref<8x1xf32, #tpu.memory_space<vmem>>, vector<8x1xf32>
    %87 = vector.broadcast %86 : vector<8x1xf32> to vector<8x512xf32>
    %88 = arith.addf %85, %87 : vector<8x512xf32>
    %cst_53 = arith.constant 0.000000e+00 : f32
    %89 = vector.broadcast %cst_53 : f32 to vector<8x512xf32>
    %90 = arith.maximumf %88, %89 : vector<8x512xf32>
    %c0_54 = arith.constant 0 : index
    %c0_55 = arith.constant 0 : index
    %91 = vector.load %arg6[%c0_54, %c0_55] : memref<4x8xbf16, #tpu.memory_space<vmem>>, vector<4x8xbf16>
    %92 = arith.truncf %90 : vector<8x512xf32> to vector<8x512xbf16>
    %cst_56 = arith.constant dense<0.000000e+00> : vector<4x512xf32>
    %93 = tpu.matmul %91, %92, %cst_56 {dimension_numbers = #tpu.dot_dimension_numbers<[1], [0], [0], [1], [0, 0, 1, 1], [], []>} : vector<4x8xbf16>, vector<8x512xbf16>, vector<4x512xf32> -> vector<4x512xf32>
    %c0_57 = arith.constant 0 : index
    %c0_58 = arith.constant 0 : index
    %94 = vector.load %arg7[%c0_57, %c0_58] : memref<4x1xf32, #tpu.memory_space<vmem>>, vector<4x1xf32>
    %95 = vector.broadcast %94 : vector<4x1xf32> to vector<4x512xf32>
    %96 = arith.addf %93, %95 : vector<4x512xf32>
    %cst_59 = arith.constant 0.000000e+00 : f32
    %97 = vector.broadcast %cst_59 : f32 to vector<4x512xf32>
    %98 = arith.maximumf %96, %97 : vector<4x512xf32>
    %c0_60 = arith.constant 0 : index
    %c0_61 = arith.constant 0 : index
    %c0_62 = arith.constant 0 : index
    %99 = vector.load %arg1[%c0_60, %c0_61, %c0_62] : memref<1x4x512xf32, #tpu.memory_space<vmem>>, vector<1x4x512xf32>
    %100 = vector.shape_cast %99 : vector<1x4x512xf32> to vector<4x512xf32>
    %101 = arith.addf %100, %98 : vector<4x512xf32>
    %cst_63 = arith.constant 0.000000e+00 : f32
    %102 = vector.broadcast %cst_63 : f32 to vector<4x512xf32>
    %103 = arith.maximumf %101, %102 : vector<4x512xf32>
    %c0_64 = arith.constant 0 : index
    %c0_65 = arith.constant 0 : index
    %c0_66 = arith.constant 0 : index
    %104 = vector.load %arg9[%c0_64, %c0_65, %c0_66] : memref<1x4x512xf32, #tpu.memory_space<vmem>>, vector<1x4x512xf32>
    %105 = vector.shape_cast %104 : vector<1x4x512xf32> to vector<4x512xf32>
    %106 = vector.shape_cast %103 : vector<4x512xf32> to vector<1x4x512xf32>
    tpu.vector_store %arg9[%c0_64, %c0_65, %c0_66], %106 {strides = array<i32>} : memref<1x4x512xf32, #tpu.memory_space<vmem>>, vector<1x4x512xf32>,
    return
  }
  func.func @transform_0(%arg0: i32) -> (i32, i32, i32) {
    %c0_i32 = arith.constant 0 : i32
    %c0_i32_0 = arith.constant 0 : i32
    %c0_i32_1 = arith.constant 0 : i32
    return %arg0, %c0_i32, %c0_i32_0 : i32, i32, i32
  }
  func.func @transform_1(%arg0: i32) -> (i32, i32) {
    %c0_i32 = arith.constant 0 : i32
    %c0_i32_0 = arith.constant 0 : i32
    %c0_i32_1 = arith.constant 0 : i32
    return %c0_i32, %c0_i32_0 : i32, i32
  }
  func.func @transform_2(%arg0: i32) -> (i32, i32) {
    %c0_i32 = arith.constant 0 : i32
    %c0_i32_0 = arith.constant 0 : i32
    %c0_i32_1 = arith.constant 0 : i32
    return %c0_i32, %c0_i32_0 : i32, i32
  }
  func.func @transform_3(%arg0: i32) -> (i32, i32, i32) {
    %c0_i32 = arith.constant 0 : i32
    %c0_i32_0 = arith.constant 0 : i32
    %c0_i32_1 = arith.constant 0 : i32
    %c0_i32_2 = arith.constant 0 : i32
    return %c0_i32, %c0_i32_0, %c0_i32_1 : i32, i32, i32
  }
  func.func @transform_4(%arg0: i32) -> (i32, i32) {
    %c0_i32 = arith.constant 0 : i32
    %c0_i32_0 = arith.constant 0 : i32
    %c0_i32_1 = arith.constant 0 : i32
    return %c0_i32, %c0_i32_0 : i32, i32
  }
  func.func @transform_5(%arg0: i32) -> (i32, i32) {
    %c0_i32 = arith.constant 0 : i32
    %c0_i32_0 = arith.constant 0 : i32
    %c0_i32_1 = arith.constant 0 : i32
    return %c0_i32, %c0_i32_0 : i32, i32
  }
  func.func @transform_6(%arg0: i32) -> (i32, i32) {
    %c0_i32 = arith.constant 0 : i32
    %c0_i32_0 = arith.constant 0 : i32
    %c0_i32_1 = arith.constant 0 : i32
    return %c0_i32, %c0_i32_0 : i32, i32
  }
  func.func @transform_7(%arg0: i32) -> (i32, i32) {
    %c0_i32 = arith.constant 0 : i32
    %c0_i32_0 = arith.constant 0 : i32
    %c0_i32_1 = arith.constant 0 : i32
    return %c0_i32, %c0_i32_0 : i32, i32
  }
  func.func @transform_8(%arg0: i32) -> (i32, i32, i32) {
    %c0_i32 = arith.constant 0 : i32
    %c0_i32_0 = arith.constant 0 : i32
    %c0_i32_1 = arith.constant 0 : i32
    return %arg0, %c0_i32, %c0_i32_0 : i32, i32, i32
  }
}

</mosaic_0001>

<bundles_post_ra>
// kernel: tpu_custom_call.1
= control target key start
LH: loop header
LB: loop body
LE: loop exit
PB: predicated region body
PF: predicated region fallthrough
CT: control target
= control target key end

     0   :  { %vm54_vm0 = vcmask 1041408   ;;  %v1683_v6 = vmov 0   ;;  %s2070_s0 = inlined_call_operand.vmem [shape: f32[1,4,512], index: 0, kind: input, shape index: {}]   ;;  %s2071_s1 = inlined_call_operand.vmem [shape: bf16[8,4], index: 1, kind: input, shape index: {}]   ;;  %s2072_s2 = inlined_call_operand.vmem [shape: f32[8,1], index: 2, kind: input, shape index: {}]   ;;  %s2073_s3 = inlined_call_operand.vmem [shape: bf16[9,8,8], index: 3, kind: input, shape index: {}]   ;;  %s2074_s4 = inlined_call_operand.vmem [shape: f32[8,1], index: 4, kind: input, shape index: {}]   ;;  %s2075_s5 = inlined_call_operand.vmem [shape: bf16[4,8], index: 5, kind: input, shape index: {}]   ;;  %s2076_s6 = inlined_call_operand.vmem [shape: f32[4,1], index: 6, kind: input, shape index: {}]   ;;  %s2077_s7 = inlined_call_operand.vmem [shape: f32[9,512], index: 7, kind: input, shape index: {}]   ;;  %s2078_s8 = inlined_call_operand.hbm [shape: f32[1,4,512], index: 8, kind: output, shape index: {}]  }
   0x1   :  { %v31_v0 = vld [vmem:[%s2070_s0] sm:$0xff]  ;;  %v32_v1 = vld [vmem:[%s2070_s0 + $0x8] sm:$0xff]  ;;  %99 = vmatprep.mubr.bf16.mxu0 %v1683_v6 }
   0x2   :  { %v35_v2 = vcombine.high %v31_v0, %v31_v0  ;;  %v36_v3 = vcombine.high %v32_v1, %v32_v1  ;;  %v39_v4 = vpack.c.bf16 %v31_v0, %v31_v0  ;;  %v41_v5 = vpack.c.bf16 %v32_v1, %v32_v1  ;;  %v44_v7 = vld [vmem:[%s2072_s2] sm:$0xff] }
   0x3   :  { %13 = vsyncpa [#allocation3], 0  ;;  %140 = vmatprep.mubr.bf16.mxu1 %v1683_v6  ;;  %1653 = vset.pattern.permute.xlu0 %v1683_v6  ;;  %v43_v12 = vld [vmem:[%s2071_s1] sm:$0xf]  ;;  %vm50_vm1 = vcmask 31744   ;;  %s1684_s1 = smov 16   ;;  %v161_v32 = vlaneseq }
   0x4   :  { %v40_v8 = vpack.c.bf16 %v35_v2, %v35_v2  ;;  %v42_v9 = vpack.c.bf16 %v36_v3, %v36_v3  ;;  %v56_v10 = vsel %vm54_vm0, %v39_v4, 0  ;;  %v62_v11 = vsel %vm54_vm0, %v41_v5, 0  ;;  %47 = vperm.xlu0 %1653, %v44_v7   ;;  %1654 = vset.pattern.permute.xlu1 %v1683_v6  ;;  %s1685_s12 = smov 17   ;;  %s1686_s13 = smov 15   ;;  %v1449_v30 = vld [vmem:[%s2076_s6] sm:$0xf] }
   0x5   :  { %s1687_s14 = smov 1   ;;  %s1688_s15 = smov 127   ;;  %v1430_v31 = vld [vmem:[%s2074_s4] sm:$0xff]  ;;  %v171_v33 = vshrl.u32 %v161_v32, 7  ;;  %v1806_v34 = vand.u32 127, %v161_v32  ;;  %vm249_vm4 = vcmask 1043456  }
   0x6   :  { %1584 = vmatprep.subr.msk.bf16.mxu0 %vm54_vm0, %v40_v8  ;;  %1586 = vmatprep.subr.msk.bf16.mxu1 %vm54_vm0, %v42_v9  ;;  %s1689_s16 = smov 113   ;;  %s1690_s17 = smov 112   ;;  %v1588_v39 = vld [vmem:[%s2077_s7 + $0x1] ss:$8 sm:$0xf]  ;;  %vm245_vm5 = vcmask 64512  }
   0x7   :  { %68 = vmatpush1.bf16.msra.mxu0 %v56_v10  ;;  %109 = vmatpush1.bf16.msra.mxu1 %v62_v11  ;;  %s1691_s18 = smov 111   ;;  %v1808_v35 = vsub.s32 1, %v171_v33  ;;  %v1810_v36 = vsub.s32 2, %v171_v33  ;;  %v1812_v37 = vsub.s32 0, %v171_v33  ;;  %v1814_v38 = vsub.s32 3, %v171_v33 }
   0x8   :  { %vm207_vm2 = vcmp.lt.s32.totalorder %v1806_v34, 16  ;;  %v168_v42 = vld [vmem:[%s2077_s7] ss:$8 sm:$0xf]  ;;  %vm163_vm3 = vcmp.lt.s32.totalorder %v1806_v34, 17  ;;  %vm449_vm6 = vcmp.lt.s32.totalorder %v1806_v34, 15 }
   0x9   :  { %v222_v43 = vrot.slane %v1588_v39, %v1808_v35  ;;  %v226_v44 = vrot.slane %v1588_v39, %v1810_v36  ;;  %v218_v45 = vrot.slane %v1588_v39, %v1812_v37  ;;  %v230_v46 = vrot.slane %v1588_v39, %v1814_v38  ;;  %v1598_v8 = vld [vmem:[%s2077_s7 + $0x2] ss:$8 sm:$0xf]  ;;  %v1589_v9 = vld [vmem:[%s2073_s3 + $0x4] sm:$0xf] }
   0xa   :  { %1585 = vmatmul.mubr.msk.bf16.vlgmr.msra.gmra.mrb[0].mxu0 %vm50_vm1, %v43_v12  ;;  %1587 = vmatmul.mubr.msk.bf16.vlgmr.msra.gmra.mrb[0].mxu1 %vm50_vm1, %v43_v12  ;;  %v177_v49 = vrot.slane %v168_v42, %v1808_v35  ;;  %v181_v1 = vrot.slane %v168_v42, %v1810_v36  ;;  %v173_v2 = vrot.slane %v168_v42, %v1812_v37  ;;  %vm596_vm7 = vcmp.lt.s32.totalorder %v1806_v34, 1 }
   0xb   :  { %294 = vmatprep.mubr.bf16.mxu0 %v1683_v6  ;;  %335 = vmatprep.mubr.bf16.mxu1 %v1683_v6  ;;  %v185_v7 = vrot.slane %v168_v42, %v1814_v38  ;;  %v194_v42 = vld [vmem:[%s2073_s3] sm:$0xf]  ;;  %vm850_vm8 = vcmp.lt.s32.totalorder %v1806_v34, 127  ;;  %vm997_vm9 = vcmp.lt.s32.totalorder %v1806_v34, 113  ;;  %vm1144_vm10 = vcmp.lt.s32.totalorder %v1806_v34, 112 }
   0xc   :  { %vm1291_vm11 = vcmp.lt.s32.totalorder %v1806_v34, 111 }
  0x83   :  { %v48_v13 = vpop.permute.xlu0 %47 }
  0xdd   :  { %v101_v14 = vpop.f32.mrb[0].mxu0  ;;  %v142_v15 = vpop.f32.mrb[0].mxu1 }
  0xde   :  { %v102_v16 = vadd.f32 %v101_v14, %v48_v13  ;;  %v143_v17 = vadd.f32 %v142_v15, %v48_v13  ;;  %v103_v18 = vpop.f32.mrb[1].mxu0  ;;  %v144_v19 = vpop.f32.mrb[1].mxu1 }
  0xdf   :  { %v105_v20 = vpop.f32.mrb[2].mxu0  ;;  %v146_v21 = vpop.f32.mrb[2].mxu1  ;;  %v104_v24 = vadd.f32 %v103_v18, %v48_v13  ;;  %v145_v25 = vadd.f32 %v144_v19, %v48_v13 }
  0xe0   :  { %v1760_v22 = vmax.f32 %v102_v16, 0.0  ;;  %v1762_v23 = vmax.f32 %v143_v17, 0.0  ;;  %v106_v26 = vpop.f32.mrb[3].mxu0  ;;  %v147_v27 = vpop.f32.mrb[3].mxu1  ;;  %v464_v16 = vrot.slane %v1598_v8, %v1808_v35 }
  0xe1   :  { %v1766_v28 = vmax.f32 %v104_v24, 0.0  ;;  %v1768_v29 = vmax.f32 %v145_v25, 0.0 }
  0xe2   :  { %203 = vrot.lane.b32.xlu1 %v1762_v23, %s1684_s1  ;;  %199 = vrot.lane.b32.xlu0 %v1760_v22, %s1684_s1 }
  0xe6   :  { %201 = vrot.lane.b32.xlu1 %v1766_v28, %s1684_s1  ;;  %205 = vrot.lane.b32.xlu0 %v1768_v29, %s1684_s1 }
  0xea   :  { %153 = vrot.lane.b32.xlu1 %v1760_v22, %s1685_s12  ;;  %155 = vrot.lane.b32.xlu0 %v1766_v28, %s1685_s12 }
  0xee   :  { %157 = vrot.lane.b32.xlu1 %v1762_v23, %s1685_s12  ;;  %159 = vrot.lane.b32.xlu0 %v1768_v29, %s1685_s12 }
  0xf2   :  { %441 = vrot.lane.b32.xlu1 %v1760_v22, %s1686_s13  ;;  %443 = vrot.lane.b32.xlu0 %v1766_v28, %s1686_s13 }
  0xf6   :  { %445 = vrot.lane.b32.xlu1 %v1762_v23, %s1686_s13  ;;  %447 = vrot.lane.b32.xlu0 %v1768_v29, %s1686_s13 }
  0xfa   :  { %588 = vrot.lane.b32.xlu1 %v1760_v22, %s1687_s14  ;;  %590 = vrot.lane.b32.xlu0 %v1766_v28, %s1687_s14 }
  0xfe   :  { %592 = vrot.lane.b32.xlu1 %v1762_v23, %s1687_s14  ;;  %594 = vrot.lane.b32.xlu0 %v1768_v29, %s1687_s14 }
 0x102   :  { %842 = vrot.lane.b32.xlu1 %v1760_v22, %s1688_s15  ;;  %844 = vrot.lane.b32.xlu0 %v1766_v28, %s1688_s15 }
 0x106   :  { %846 = vrot.lane.b32.xlu1 %v1762_v23, %s1688_s15  ;;  %848 = vrot.lane.b32.xlu0 %v1768_v29, %s1688_s15 }
 0x10a   :  { %989 = vrot.lane.b32.xlu1 %v1760_v22, %s1689_s16  ;;  %991 = vrot.lane.b32.xlu0 %v1766_v28, %s1689_s16 }
 0x10e   :  { %993 = vrot.lane.b32.xlu1 %v1762_v23, %s1689_s16  ;;  %995 = vrot.lane.b32.xlu0 %v1768_v29, %s1689_s16 }
 0x112   :  { %1136 = vrot.lane.b32.xlu1 %v1760_v22, %s1690_s17  ;;  %1138 = vrot.lane.b32.xlu0 %v1766_v28, %s1690_s17 }
 0x116   :  { %1140 = vrot.lane.b32.xlu1 %v1762_v23, %s1690_s17  ;;  %1142 = vrot.lane.b32.xlu0 %v1768_v29, %s1690_s17 }
 0x11a   :  { %1283 = vrot.lane.b32.xlu1 %v1760_v22, %s1691_s18  ;;  %1285 = vrot.lane.b32.xlu0 %v1766_v28, %s1691_s18 }
 0x11e   :  { %1287 = vrot.lane.b32.xlu1 %v1762_v23, %s1691_s18  ;;  %1289 = vrot.lane.b32.xlu0 %v1768_v29, %s1691_s18 }
 0x122   :  { %1452 = vperm.xlu0 %1653, %v1449_v30   ;;  %1433 = vperm.xlu1 %1654, %v1430_v31   ;;  %v468_v30 = vrot.slane %v1598_v8, %v1810_v36  ;;  %v460_v31 = vrot.slane %v1598_v8, %v1812_v37 }
 0x154   :  { %v204_v40 = vpop.permute.xlu1 %203  ;;  %v200_v41 = vpop.permute.xlu0 %199 }
 0x158   :  { %v202_v47 = vpop.permute.xlu1 %201  ;;  %v206_v48 = vpop.permute.xlu0 %205 }
 0x159   :  { %v209_v50 = vsel %vm207_vm2, %v202_v47, %v204_v40  ;;  %v210_v51 = vsel %vm207_vm2, %v200_v41, %v202_v47  ;;  %v208_v52 = vsel %vm207_vm2, %v204_v40, %v206_v48  ;;  %v211_v53 = vsel %vm207_vm2, %v206_v48, %v200_v41  ;;  %v1604_v41 = vld [vmem:[%s2077_s7 + $0x3] ss:$8 sm:$0xf] }
 0x15a   :  { %v236_v54 = vmul.f32 %v222_v43, %v210_v51  ;;  %v237_v55 = vmul.f32 %v226_v44, %v209_v50  ;;  %v235_v56 = vmul.f32 %v218_v45, %v211_v53  ;;  %v238_v57 = vmul.f32 %v230_v46, %v208_v52 }
 0x15b   :  { %v472_v40 = vrot.slane %v1598_v8, %v1814_v38 }
 0x15c   :  { %v242_v58 = vpack.c.bf16 %v236_v54, %v236_v54  ;;  %v243_v59 = vpack.c.bf16 %v237_v55, %v237_v55  ;;  %v241_v60 = vpack.c.bf16 %v235_v56, %v235_v56  ;;  %v244_v61 = vpack.c.bf16 %v238_v57, %v238_v57  ;;  %v154_v62 = vpop.permute.xlu1 %153  ;;  %v156_v63 = vpop.permute.xlu0 %155 }
 0x15d   :  { %v166_v0 = vsel %vm163_vm3, %v154_v62, %v156_v63 }
 0x15e   :  { %v191_v3 = vmul.f32 %v177_v49, %v166_v0  ;;  %1590 = vmatprep.subr.msk.bf16.mxu0 %vm249_vm4, %v242_v58  ;;  %1592 = vmatprep.subr.msk.bf16.mxu1 %vm249_vm4, %v244_v61  ;;  %v251_v4 = vsel %vm249_vm4, %v241_v60, 0  ;;  %v257_v5 = vsel %vm249_vm4, %v243_v59, 0  ;;  %v611_v49 = vrot.slane %v1604_v41, %v1808_v35 }
 0x15f   :  { %263 = vmatpush1.bf16.msra.mxu0 %v251_v4  ;;  %304 = vmatpush1.bf16.msra.mxu1 %v257_v5  ;;  %v615_v59 = vrot.slane %v1604_v41, %v1810_v36  ;;  %v607_v60 = vrot.slane %v1604_v41, %v1812_v37  ;;  %v619_v0 = vrot.slane %v1604_v41, %v1814_v38 }
 0x160   :  { %v196_v10 = vpack.c.bf16 %v191_v3, %v191_v3  ;;  %v158_v11 = vpop.permute.xlu1 %157  ;;  %v160_v12 = vpop.permute.xlu0 %159 }
 0x161   :  { %v165_v13 = vsel %vm163_vm3, %v156_v63, %v158_v11  ;;  %v164_v14 = vsel %vm163_vm3, %v158_v11, %v160_v12  ;;  %v167_v15 = vsel %vm163_vm3, %v160_v12, %v154_v62 }
 0x162   :  { %v192_v17 = vmul.f32 %v181_v1, %v165_v13  ;;  %v190_v18 = vmul.f32 %v173_v2, %v167_v15  ;;  %v193_v19 = vmul.f32 %v185_v7, %v164_v14  ;;  %1591 = vmatmul.mubr.msk.bf16.vlgmr.msra.gmra.mrb[4].mxu0 %vm245_vm5, %v1589_v9  ;;  %1593 = vmatmul.mubr.msk.bf16.vlgmr.msra.gmra.mrb[4].mxu1 %vm245_vm5, %v1589_v9  ;;  %v1599_v1 = vld [vmem:[%s2073_s3 + $0x8] sm:$0xf]  ;;  %v1615_v9 = vld [vmem:[%s2077_s7 + $0x5] ss:$8 sm:$0xf] }
 0x163   :  { %1594 = vmatprep.subr.msk.bf16.mxu0 %vm249_vm4, %v196_v10  ;;  %391 = vmatprep.mubr.bf16.mxu0 %v1683_v6  ;;  %v737_v13 = vpack.c.bf16 %v1760_v22, %v1760_v22  ;;  %v739_v14 = vpack.c.bf16 %v1762_v23, %v1762_v23  ;;  %v738_v22 = vpack.c.bf16 %v1766_v28, %v1766_v28 }
 0x164   :  { %v197_v20 = vpack.c.bf16 %v192_v17, %v192_v17  ;;  %v195_v21 = vpack.c.bf16 %v190_v18, %v190_v18  ;;  %v198_v24 = vpack.c.bf16 %v193_v19, %v193_v19  ;;  %v442_v25 = vpop.permute.xlu1 %441  ;;  %v444_v26 = vpop.permute.xlu0 %443  ;;  %432 = vmatprep.mubr.bf16.mxu1 %v1683_v6  ;;  %v861_v19 = vrot.slane %v1615_v9, %v1812_v37 }
 0x165   :  { %v452_v27 = vsel %vm449_vm6, %v442_v25, %v444_v26  ;;  %v740_v23 = vpack.c.bf16 %v1768_v29, %v1768_v29  ;;  %v745_v41 = vsel %vm249_vm4, %v737_v13, 0 }
 0x166   :  { %v478_v32 = vmul.f32 %v464_v16, %v452_v27  ;;  %1596 = vmatprep.subr.msk.bf16.mxu1 %vm249_vm4, %v198_v24  ;;  %v348_v33 = vsel %vm249_vm4, %v195_v21, 0  ;;  %v354_v39 = vsel %vm249_vm4, %v197_v20, 0  ;;  %v865_v24 = vrot.slane %v1615_v9, %v1808_v35 }
 0x167   :  { %360 = vmatpush1.bf16.msra.mxu0 %v348_v33  ;;  %401 = vmatpush1.bf16.msra.mxu1 %v354_v39  ;;  %v869_v27 = vrot.slane %v1615_v9, %v1810_v36 }
 0x168   :  { %v484_v43 = vpack.c.bf16 %v478_v32, %v478_v32  ;;  %v446_v44 = vpop.permute.xlu1 %445  ;;  %v448_v45 = vpop.permute.xlu0 %447 }
 0x169   :  { %v451_v46 = vsel %vm449_vm6, %v444_v26, %v446_v44  ;;  %v450_v47 = vsel %vm449_vm6, %v446_v44, %v448_v45  ;;  %v453_v48 = vsel %vm449_vm6, %v448_v45, %v442_v25  ;;  %v751_v45 = vsel %vm249_vm4, %v739_v14, 0 }
 0x16a   :  { %v479_v50 = vmul.f32 %v468_v30, %v451_v46  ;;  %v477_v51 = vmul.f32 %v460_v31, %v453_v48  ;;  %v480_v52 = vmul.f32 %v472_v40, %v450_v47  ;;  %1595 = vmatmul.mubr.msk.bf16.vlgmr.msra.gmra.mrb[8].mxu0 %vm245_vm5, %v194_v42  ;;  %1597 = vmatmul.mubr.msk.bf16.vlgmr.msra.gmra.mrb[8].mxu1 %vm245_vm5, %v194_v42  ;;  %v1605_v31 = vld [vmem:[%s2073_s3 + $0xc] sm:$0xf] }
 0x16b   :  { %1600 = vmatprep.subr.msk.bf16.mxu0 %vm249_vm4, %v484_v43  ;;  %534 = vmatprep.mubr.bf16.mxu0 %v1683_v6  ;;  %v873_v30 = vrot.slane %v1615_v9, %v1814_v38  ;;  %v1621_v46 = vld [vmem:[%s2077_s7 + $0x6] ss:$8 sm:$0xf] }
 0x16c   :  { %v485_v53 = vpack.c.bf16 %v479_v50, %v479_v50  ;;  %v483_v54 = vpack.c.bf16 %v477_v51, %v477_v51  ;;  %v486_v55 = vpack.c.bf16 %v480_v52, %v480_v52  ;;  %v589_v56 = vpop.permute.xlu1 %588  ;;  %v591_v57 = vpop.permute.xlu0 %590  ;;  %575 = vmatprep.mubr.bf16.mxu1 %v1683_v6  ;;  %v1008_v52 = vrot.slane %v1621_v46, %v1812_v37 }
 0x16d   :  { %v599_v58 = vsel %vm596_vm7, %v589_v56, %v591_v57 }
 0x16e   :  { %v625_v61 = vmul.f32 %v611_v49, %v599_v58  ;;  %1602 = vmatprep.subr.msk.bf16.mxu1 %vm249_vm4, %v486_v55  ;;  %v491_v62 = vsel %vm249_vm4, %v483_v54, 0  ;;  %v497_v63 = vsel %vm249_vm4, %v485_v53, 0  ;;  %v1012_v53 = vrot.slane %v1621_v46, %v1808_v35  ;;  %v1610_v58 = vld [vmem:[%s2073_s3 + $0x10] sm:$0xf] }
 0x16f   :  { %503 = vmatpush1.bf16.msra.mxu0 %v491_v62  ;;  %544 = vmatpush1.bf16.msra.mxu1 %v497_v63  ;;  %v1016_v54 = vrot.slane %v1621_v46, %v1810_v36 }
 0x170   :  { %v631_v2 = vpack.c.bf16 %v625_v61, %v625_v61  ;;  %v593_v3 = vpop.permute.xlu1 %592  ;;  %v595_v4 = vpop.permute.xlu0 %594 }
 0x171   :  { %v598_v5 = vsel %vm596_vm7, %v591_v57, %v593_v3  ;;  %v597_v7 = vsel %vm596_vm7, %v593_v3, %v595_v4  ;;  %v600_v8 = vsel %vm596_vm7, %v595_v4, %v589_v56  ;;  %v1020_v57 = vrot.slane %v1621_v46, %v1814_v38 }
 0x172   :  { %v626_v10 = vmul.f32 %v615_v59, %v598_v5  ;;  %v624_v11 = vmul.f32 %v607_v60, %v600_v8  ;;  %v627_v12 = vmul.f32 %v619_v0, %v597_v7  ;;  %1601 = vmatmul.mubr.msk.bf16.vlgmr.msra.gmra.mrb[12].mxu0 %vm245_vm5, %v1599_v1  ;;  %1603 = vmatmul.mubr.msk.bf16.vlgmr.msra.gmra.mrb[12].mxu1 %vm245_vm5, %v1599_v1 }
 0x173   :  { %1606 = vmatprep.subr.msk.bf16.mxu0 %vm249_vm4, %v631_v2  ;;  %681 = vmatprep.mubr.bf16.mxu0 %v1683_v6  ;;  %v1627_v2 = vld [vmem:[%s2077_s7 + $0x7] ss:$8 sm:$0xf] }
 0x174   :  { %v632_v15 = vpack.c.bf16 %v626_v10, %v626_v10  ;;  %v630_v16 = vpack.c.bf16 %v624_v11, %v624_v11  ;;  %v633_v17 = vpack.c.bf16 %v627_v12, %v627_v12  ;;  %v843_v18 = vpop.permute.xlu1 %842  ;;  %v845_v20 = vpop.permute.xlu0 %844  ;;  %722 = vmatprep.mubr.bf16.mxu1 %v1683_v6  ;;  %v1155_v11 = vrot.slane %v1627_v2, %v1812_v37 }
 0x175   :  { %v853_v21 = vsel %vm850_vm8, %v843_v18, %v845_v20 }
 0x176   :  { %1608 = vmatprep.subr.msk.bf16.mxu1 %vm249_vm4, %v633_v17  ;;  %v638_v25 = vsel %vm249_vm4, %v630_v16, 0  ;;  %v644_v26 = vsel %vm249_vm4, %v632_v15, 0  ;;  %v878_v28 = vmul.f32 %v861_v19, %v853_v21  ;;  %v1159_v15 = vrot.slane %v1627_v2, %v1808_v35  ;;  %v1616_v19 = vld [vmem:[%s2073_s3 + $0x14] sm:$0xf] }
 0x177   :  { %650 = vmatpush1.bf16.msra.mxu0 %v638_v25  ;;  %691 = vmatpush1.bf16.msra.mxu1 %v644_v26  ;;  %v1163_v17 = vrot.slane %v1627_v2, %v1810_v36 }
 0x178   :  { %v847_v32 = vpop.permute.xlu1 %846  ;;  %1611 = vmatprep.subr.msk.bf16.mxu0 %vm249_vm4, %v738_v22  ;;  %1613 = vmatprep.subr.msk.bf16.mxu1 %vm249_vm4, %v740_v23  ;;  %v849_v29 = vpop.permute.xlu0 %848  ;;  %v884_v47 = vpack.c.bf16 %v878_v28, %v878_v28 }
 0x179   :  { %v852_v33 = vsel %vm850_vm8, %v845_v20, %v847_v32  ;;  %v851_v39 = vsel %vm850_vm8, %v847_v32, %v849_v29  ;;  %v854_v40 = vsel %vm850_vm8, %v849_v29, %v843_v18  ;;  %v1167_v18 = vrot.slane %v1627_v2, %v1814_v38  ;;  %v1633_v32 = vld [vmem:[%s2077_s7 + $0x20] ss:$8 sm:$0xf] }
 0x17a   :  { %v879_v42 = vmul.f32 %v865_v24, %v852_v33  ;;  %v880_v43 = vmul.f32 %v869_v27, %v851_v39  ;;  %v881_v44 = vmul.f32 %v873_v30, %v854_v40  ;;  %1607 = vmatmul.mubr.msk.bf16.vlgmr.msra.gmra.mrb[16].mxu0 %vm245_vm5, %v1605_v31  ;;  %1609 = vmatmul.mubr.msk.bf16.vlgmr.msra.gmra.mrb[16].mxu1 %vm245_vm5, %v1605_v31  ;;  %v892_v61 = vsel %vm249_vm4, %v884_v47, 0 }
 0x17b   :  { %757 = vmatpush1.bf16.msra.mxu0 %v745_v41  ;;  %798 = vmatpush1.bf16.msra.mxu1 %v751_v45  ;;  %v1314_v47 = vrot.slane %v1633_v32, %v1814_v38 }
 0x17c   :  { %v885_v48 = vpack.c.bf16 %v879_v42, %v879_v42  ;;  %v887_v49 = vpack.c.bf16 %v881_v44, %v881_v44  ;;  %v990_v50 = vpop.permute.xlu1 %989  ;;  %v992_v51 = vpop.permute.xlu0 %991  ;;  %788 = vmatprep.mubr.bf16.mxu0 %v1683_v6  ;;  %829 = vmatprep.mubr.bf16.mxu1 %v1683_v6  ;;  %v886_v55 = vpack.c.bf16 %v880_v43, %v880_v43 }
 0x17d   :  { %v1000_v56 = vsel %vm997_vm9, %v990_v50, %v992_v51  ;;  %v1302_v42 = vrot.slane %v1633_v32, %v1812_v37  ;;  %v1306_v43 = vrot.slane %v1633_v32, %v1808_v35  ;;  %v1310_v44 = vrot.slane %v1633_v32, %v1810_v36 }
 0x17e   :  { %1617 = vmatprep.subr.msk.bf16.mxu0 %vm249_vm4, %v885_v48  ;;  %1619 = vmatprep.subr.msk.bf16.mxu1 %vm249_vm4, %v887_v49  ;;  %v1025_v62 = vmul.f32 %v1008_v52, %v1000_v56  ;;  %v898_v7 = vsel %vm249_vm4, %v886_v55, 0  ;;  %v1622_v48 = vld [vmem:[%s2073_s3 + $0x18] sm:$0xf] }
 0x180   :  { %v994_v59 = vpop.permute.xlu1 %993  ;;  %v996_v60 = vpop.permute.xlu0 %995  ;;  %v1031_v13 = vpack.c.bf16 %v1025_v62, %v1025_v62  ;;  %v1634_v62 = vld [vmem:[%s2073_s3 + $0x20] sm:$0xf] }
 0x181   :  { %v999_v63 = vsel %vm997_vm9, %v992_v51, %v994_v59  ;;  %v998_v0 = vsel %vm997_vm9, %v994_v59, %v996_v60  ;;  %v1001_v1 = vsel %vm997_vm9, %v996_v60, %v990_v50  ;;  %v1628_v59 = vld [vmem:[%s2073_s3 + $0x1c] sm:$0xf] }
 0x182   :  { %v1026_v3 = vmul.f32 %v1012_v53, %v999_v63  ;;  %v1027_v4 = vmul.f32 %v1016_v54, %v998_v0  ;;  %v1028_v5 = vmul.f32 %v1020_v57, %v1001_v1  ;;  %1612 = vmatmul.mubr.msk.bf16.vlgmr.msra.gmra.mrb[20].mxu0 %vm245_vm5, %v1610_v58  ;;  %1614 = vmatmul.mubr.msk.bf16.vlgmr.msra.gmra.mrb[20].mxu1 %vm245_vm5, %v1610_v58  ;;  %v1039_v26 = vsel %vm249_vm4, %v1031_v13, 0 }
 0x183   :  { %904 = vmatpush1.bf16.msra.mxu0 %v892_v61  ;;  %945 = vmatpush1.bf16.msra.mxu1 %v898_v7 }
 0x184   :  { %v1032_v8 = vpack.c.bf16 %v1026_v3, %v1026_v3  ;;  %v1034_v9 = vpack.c.bf16 %v1028_v5, %v1028_v5  ;;  %v1137_v10 = vpop.permute.xlu1 %1136  ;;  %v1139_v12 = vpop.permute.xlu0 %1138  ;;  %935 = vmatprep.mubr.bf16.mxu0 %v1683_v6  ;;  %976 = vmatprep.mubr.bf16.mxu1 %v1683_v6  ;;  %v1033_v16 = vpack.c.bf16 %v1027_v4, %v1027_v4 }
 0x185   :  { %v1147_v14 = vsel %vm1144_vm10, %v1137_v10, %v1139_v12 }
 0x186   :  { %1623 = vmatprep.subr.msk.bf16.mxu0 %vm249_vm4, %v1032_v8  ;;  %1625 = vmatprep.subr.msk.bf16.mxu1 %vm249_vm4, %v1034_v9  ;;  %v1172_v20 = vmul.f32 %v1155_v11, %v1147_v14  ;;  %v1045_v28 = vsel %vm249_vm4, %v1033_v16, 0 }
 0x188   :  { %v1141_v21 = vpop.permute.xlu1 %1140  ;;  %v1143_v24 = vpop.permute.xlu0 %1142  ;;  %v1178_v29 = vpack.c.bf16 %v1172_v20, %v1172_v20 }
 0x189   :  { %v1146_v22 = vsel %vm1144_vm10, %v1139_v12, %v1141_v21  ;;  %v1145_v23 = vsel %vm1144_vm10, %v1141_v21, %v1143_v24  ;;  %v1148_v25 = vsel %vm1144_vm10, %v1143_v24, %v1137_v10 }
 0x18a   :  { %v1173_v27 = vmul.f32 %v1159_v15, %v1146_v22  ;;  %v1174_v30 = vmul.f32 %v1163_v17, %v1145_v23  ;;  %v1175_v31 = vmul.f32 %v1167_v18, %v1148_v25  ;;  %1618 = vmatmul.mubr.msk.bf16.vlgmr.msra.gmra.mrb[24].mxu0 %vm245_vm5, %v1616_v19  ;;  %1620 = vmatmul.mubr.msk.bf16.vlgmr.msra.gmra.mrb[24].mxu1 %vm245_vm5, %v1616_v19  ;;  %v1186_v35 = vsel %vm249_vm4, %v1178_v29, 0 }
 0x18b   :  { %1051 = vmatpush1.bf16.msra.mxu0 %v1039_v26  ;;  %1092 = vmatpush1.bf16.msra.mxu1 %v1045_v28 }
 0x18c   :  { %v1179_v33 = vpack.c.bf16 %v1173_v27, %v1173_v27  ;;  %v1181_v39 = vpack.c.bf16 %v1175_v31, %v1175_v31  ;;  %v1284_v40 = vpop.permute.xlu1 %1283  ;;  %v1286_v41 = vpop.permute.xlu0 %1285  ;;  %1082 = vmatprep.mubr.bf16.mxu0 %v1683_v6  ;;  %1123 = vmatprep.mubr.bf16.mxu1 %v1683_v6  ;;  %v1180_v45 = vpack.c.bf16 %v1174_v30, %v1174_v30 }
 0x18d   :  { %v1294_v46 = vsel %vm1291_vm11, %v1284_v40, %v1286_v41 }
 0x18e   :  { %1629 = vmatprep.subr.msk.bf16.mxu0 %vm249_vm4, %v1179_v33  ;;  %1631 = vmatprep.subr.msk.bf16.mxu1 %vm249_vm4, %v1181_v39  ;;  %v1319_v50 = vmul.f32 %v1302_v42, %v1294_v46  ;;  %v1192_v55 = vsel %vm249_vm4, %v1180_v45, 0 }
 0x190   :  { %v1288_v49 = vpop.permute.xlu1 %1287  ;;  %v1290_v37 = vpop.permute.xlu0 %1289  ;;  %v1325_v58 = vpack.c.bf16 %v1319_v50, %v1319_v50 }
 0x191   :  { %v1293_v36 = vsel %vm1291_vm11, %v1286_v41, %v1288_v49  ;;  %v1292_v51 = vsel %vm1291_vm11, %v1288_v49, %v1290_v37  ;;  %v1295_v52 = vsel %vm1291_vm11, %v1290_v37, %v1284_v40 }
 0x192   :  { %v1320_v53 = vmul.f32 %v1306_v43, %v1293_v36  ;;  %v1321_v38 = vmul.f32 %v1310_v44, %v1292_v51  ;;  %v1322_v54 = vmul.f32 %v1314_v47, %v1295_v52  ;;  %1624 = vmatmul.mubr.msk.bf16.vlgmr.msra.gmra.mrb[28].mxu0 %vm245_vm5, %v1622_v48  ;;  %1626 = vmatmul.mubr.msk.bf16.vlgmr.msra.gmra.mrb[28].mxu1 %vm245_vm5, %v1622_v48  ;;  %v1333_v60 = vsel %vm249_vm4, %v1325_v58, 0 }
 0x193   :  { %1198 = vmatpush1.bf16.msra.mxu0 %v1186_v35  ;;  %1239 = vmatpush1.bf16.msra.mxu1 %v1192_v55 }
 0x194   :  { %v1326_v56 = vpack.c.bf16 %v1320_v53, %v1320_v53  ;;  %v1328_v57 = vpack.c.bf16 %v1322_v54, %v1322_v54  ;;  %1229 = vmatprep.mubr.bf16.mxu0 %v1683_v6  ;;  %1270 = vmatprep.mubr.bf16.mxu1 %v1683_v6  ;;  %v1327_v34 = vpack.c.bf16 %v1321_v38, %v1321_v38 }
 0x196   :  { %1635 = vmatprep.subr.msk.bf16.mxu0 %vm249_vm4, %v1326_v56  ;;  %1637 = vmatprep.subr.msk.bf16.mxu1 %vm249_vm4, %v1328_v57  ;;  %v1339_v61 = vsel %vm249_vm4, %v1327_v34, 0 }
 0x19a   :  { %1630 = vmatmul.mubr.msk.bf16.vlgmr.msra.gmra.mrb[32].mxu0 %vm245_vm5, %v1628_v59  ;;  %1632 = vmatmul.mubr.msk.bf16.vlgmr.msra.gmra.mrb[32].mxu1 %vm245_vm5, %v1628_v59 }
 0x19b   :  { %1345 = vmatpush1.bf16.msra.mxu0 %v1333_v60  ;;  %1386 = vmatpush1.bf16.msra.mxu1 %v1339_v61 }
 0x19c   :  { %1417 = vmatprep.mubr.bf16.mxu1 %v1683_v6  ;;  %1376 = vmatprep.mubr.bf16.mxu0 %v1683_v6 }
 0x1a2   :  { %1636 = vmatmul.mubr.msk.bf16.vlgmr.msra.gmra.mrb[36].mxu0 %vm245_vm5, %v1634_v62  ;;  %1638 = vmatmul.mubr.msk.bf16.vlgmr.msra.gmra.mrb[36].mxu1 %vm245_vm5, %v1634_v62 }
 0x1a3   :  { %1502 = vmatprep.mubr.bf16.mxu0 %v1683_v6  ;;  %1543 = vmatprep.mubr.bf16.mxu1 %v1683_v6 }
 0x235   :  { %v296_v63 = vpop.f32.mrb[4].mxu0  ;;  %v337_v0 = vpop.f32.mrb[4].mxu1 }
 0x236   :  { %v298_v1 = vpop.f32.mrb[5].mxu0  ;;  %v339_v2 = vpop.f32.mrb[5].mxu1 }
 0x237   :  { %v300_v3 = vpop.f32.mrb[6].mxu0  ;;  %v341_v4 = vpop.f32.mrb[6].mxu1 }
 0x238   :  { %v301_v5 = vpop.f32.mrb[7].mxu0  ;;  %v342_v7 = vpop.f32.mrb[7].mxu1 }
 0x23d   :  { %v393_v8 = vpop.f32.mrb[8].mxu0  ;;  %v434_v9 = vpop.f32.mrb[8].mxu1 }
 0x23e   :  { %v394_v10 = vadd.f32 %v393_v8, %v296_v63  ;;  %v435_v11 = vadd.f32 %v434_v9, %v337_v0  ;;  %v395_v12 = vpop.f32.mrb[9].mxu0  ;;  %v436_v13 = vpop.f32.mrb[9].mxu1 }
 0x23f   :  { %v396_v14 = vadd.f32 %v395_v12, %v298_v1  ;;  %v437_v15 = vadd.f32 %v436_v13, %v339_v2  ;;  %v397_v16 = vpop.f32.mrb[10].mxu0  ;;  %v438_v17 = vpop.f32.mrb[10].mxu1 }
 0x240   :  { %v398_v18 = vpop.f32.mrb[11].mxu0  ;;  %v439_v6 = vpop.f32.mrb[11].mxu1 }
 0x245   :  { %v536_v19 = vpop.f32.mrb[12].mxu0  ;;  %v577_v20 = vpop.f32.mrb[12].mxu1 }
 0x246   :  { %v584_v21 = vadd.f32 %v536_v19, %v394_v10  ;;  %v586_v24 = vadd.f32 %v577_v20, %v435_v11  ;;  %v538_v22 = vpop.f32.mrb[13].mxu0  ;;  %v579_v23 = vpop.f32.mrb[13].mxu1 }
 0x247   :  { %v585_v25 = vadd.f32 %v538_v22, %v396_v14  ;;  %v587_v26 = vadd.f32 %v579_v23, %v437_v15  ;;  %v540_v27 = vpop.f32.mrb[14].mxu0  ;;  %v581_v30 = vpop.f32.mrb[14].mxu1 }
 0x248   :  { %v541_v31 = vpop.f32.mrb[15].mxu0  ;;  %v582_v28 = vpop.f32.mrb[15].mxu1 }
 0x249   :  { %v1434_v27 = vpop.permute.xlu1 %1433 }
 0x24d   :  { %v683_v32 = vpop.f32.mrb[16].mxu0  ;;  %v724_v29 = vpop.f32.mrb[16].mxu1 }
 0x24e   :  { %v731_v33 = vadd.f32 %v683_v32, %v584_v21  ;;  %v733_v39 = vadd.f32 %v724_v29, %v586_v24  ;;  %v685_v40 = vpop.f32.mrb[17].mxu0  ;;  %v726_v41 = vpop.f32.mrb[17].mxu1 }
 0x24f   :  { %v732_v42 = vadd.f32 %v685_v40, %v585_v25  ;;  %v734_v43 = vadd.f32 %v726_v41, %v587_v26  ;;  %v687_v44 = vpop.f32.mrb[18].mxu0  ;;  %v728_v45 = vpop.f32.mrb[18].mxu1 }
 0x250   :  { %v688_v46 = vpop.f32.mrb[19].mxu0  ;;  %v729_v47 = vpop.f32.mrb[19].mxu1 }
 0x255   :  { %v790_v48 = vpop.f32.mrb[20].mxu0  ;;  %v831_v49 = vpop.f32.mrb[20].mxu1 }
 0x256   :  { %v838_v37 = vadd.f32 %v790_v48, %v731_v33  ;;  %v840_v35 = vadd.f32 %v831_v49, %v733_v39  ;;  %v792_v50 = vpop.f32.mrb[21].mxu0  ;;  %v833_v36 = vpop.f32.mrb[21].mxu1 }
 0x257   :  { %v839_v51 = vadd.f32 %v792_v50, %v732_v42  ;;  %v841_v52 = vadd.f32 %v833_v36, %v734_v43  ;;  %v794_v53 = vpop.f32.mrb[22].mxu0  ;;  %v835_v38 = vpop.f32.mrb[22].mxu1 }
 0x258   :  { %v795_v54 = vpop.f32.mrb[23].mxu0  ;;  %v836_v55 = vpop.f32.mrb[23].mxu1 }
 0x259   :  { %v1444_v55 = vld [vmem:[%s2075_s5] sm:$0x3]  ;;  %s1692_s5 = smov [#allocation2]  }
 0x25a   :  { %s1576_s29 = sshll.u32 %s1692_s5, 4  ;;  %s1577_s29 = int_to_ptr.vmem [resolvable:$true] %s1576_s29 }
 0x25b   :  { %s1659_s11 = scalar_lea.vmem %s1577_s29, 256  ;;  %p1664_p1 = scmp.lt.s32.totalorder %s1577_s29, %s1577_s29 }
 0x25c   :  { %p1660_p0 = scmp.ne.s32.totalorder %s1577_s29, %s1659_s11  ;;  %p1665_p2 = scmp.lt.s32.totalorder %s1659_s11, %s1659_s11 }
 0x25d   :  { %v937_v56 = vpop.f32.mrb[24].mxu0  ;;  %v978_v57 = vpop.f32.mrb[24].mxu1 }
 0x25e   :  { %v985_v58 = vadd.f32 %v937_v56, %v838_v37  ;;  %v987_v34 = vadd.f32 %v978_v57, %v840_v35  ;;  %v939_v59 = vpop.f32.mrb[25].mxu0  ;;  %v980_v60 = vpop.f32.mrb[25].mxu1  ;;  %p1666_p3 = por %p1665_p2, %p1664_p1 }
 0x25f   :  { %v986_v61 = vadd.f32 %v939_v59, %v839_v51  ;;  %v988_v62 = vadd.f32 %v980_v60, %v841_v52  ;;  %v941_v63 = vpop.f32.mrb[26].mxu0  ;;  %v982_v0 = vpop.f32.mrb[26].mxu1 }
 0x260   :  { %v942_v1 = vpop.f32.mrb[27].mxu0  ;;  %v983_v2 = vpop.f32.mrb[27].mxu1  ;;  %p1667_p4 = pnand %p1666_p3, %p1660_p0 }
 0x261   :  { %v1453_v56 = vpop.permute.xlu0 %1452 }
 0x265   :  { %v1084_v3 = vpop.f32.mrb[28].mxu0  ;;  %v1125_v4 = vpop.f32.mrb[28].mxu1 }
 0x266   :  { %v1132_v5 = vadd.f32 %v1084_v3, %v985_v58  ;;  %v1134_v7 = vadd.f32 %v1125_v4, %v987_v34  ;;  %v1086_v8 = vpop.f32.mrb[29].mxu0  ;;  %v1127_v9 = vpop.f32.mrb[29].mxu1 }
 0x267   :  { %v1133_v10 = vadd.f32 %v1086_v8, %v986_v61  ;;  %v1135_v11 = vadd.f32 %v1127_v9, %v988_v62  ;;  %v1088_v12 = vpop.f32.mrb[30].mxu0  ;;  %v1129_v13 = vpop.f32.mrb[30].mxu1 }
 0x268   :  { %v1089_v14 = vpop.f32.mrb[31].mxu0  ;;  %v1130_v15 = vpop.f32.mrb[31].mxu1  ;;  %v1658_v13 = vld [vmem:[%s2070_s0 + $0x8] sm:$0xff] }
 0x26d   :  { %v1231_v16 = vpop.f32.mrb[32].mxu0  ;;  %v1272_v17 = vpop.f32.mrb[32].mxu1 }
 0x26e   :  { %v1279_v18 = vadd.f32 %v1231_v16, %v1132_v5  ;;  %v1281_v6 = vadd.f32 %v1272_v17, %v1134_v7  ;;  %v1233_v19 = vpop.f32.mrb[33].mxu0  ;;  %v1274_v20 = vpop.f32.mrb[33].mxu1 }
 0x26f   :  { %v1280_v21 = vadd.f32 %v1233_v19, %v1133_v10  ;;  %v1282_v24 = vadd.f32 %v1274_v20, %v1135_v11  ;;  %v1235_v22 = vpop.f32.mrb[34].mxu0  ;;  %v1276_v23 = vpop.f32.mrb[34].mxu1  ;;  %v1657_v11 = vld [vmem:[%s2070_s0] sm:$0xff] }
 0x270   :  { %v1236_v25 = vpop.f32.mrb[35].mxu0  ;;  %v1277_v26 = vpop.f32.mrb[35].mxu1 }
 0x275   :  { %v1378_v30 = vpop.f32.mrb[36].mxu0  ;;  %v1419_v31 = vpop.f32.mrb[36].mxu1 }
 0x276   :  { %v1426_v28 = vadd.f32 %v1378_v30, %v1279_v18  ;;  %v1428_v32 = vadd.f32 %v1419_v31, %v1281_v6  ;;  %v1380_v29 = vpop.f32.mrb[37].mxu0  ;;  %v1421_v33 = vpop.f32.mrb[37].mxu1 }
 0x277   :  { %v1427_v39 = vadd.f32 %v1380_v29, %v1280_v21  ;;  %v1429_v40 = vadd.f32 %v1421_v33, %v1282_v24  ;;  %v1382_v41 = vpop.f32.mrb[38].mxu0  ;;  %v1423_v42 = vpop.f32.mrb[38].mxu1 }
 0x278   :  { %v1436_v43 = vadd.f32 %v1434_v27, %v1426_v28  ;;  %v1438_v44 = vadd.f32 %v1434_v27, %v1428_v32  ;;  %v1383_v45 = vpop.f32.mrb[39].mxu0  ;;  %v1424_v46 = vpop.f32.mrb[39].mxu1 }
 0x279   :  { %v1437_v47 = vadd.f32 %v1434_v27, %v1427_v39  ;;  %v1439_v48 = vadd.f32 %v1434_v27, %v1429_v40 }
 0x27a   :  { %v1440_v49 = vmax.f32 %v1436_v43, 0.0  ;;  %v1442_v37 = vmax.f32 %v1438_v44, 0.0 }
 0x27b   :  { %v1441_v35 = vmax.f32 %v1437_v47, 0.0  ;;  %v1443_v50 = vmax.f32 %v1439_v48, 0.0 }
 0x27c   :  { %v1445_v36 = vpack.c.bf16 %v1440_v49, %v1440_v49  ;;  %v1447_v51 = vpack.c.bf16 %v1442_v37, %v1442_v37 }
 0x27d   :  { %v1446_v52 = vpack.c.bf16 %v1441_v35, %v1441_v35  ;;  %v1448_v53 = vpack.c.bf16 %v1443_v50, %v1443_v50 }
 0x27e   :  { %v1459_v38 = vsel %vm249_vm4, %v1445_v36, 0  ;;  %v1465_v54 = vsel %vm249_vm4, %v1447_v51, 0 }
 0x27f   :  { %1639 = vmatprep.subr.msk.bf16.mxu0 %vm249_vm4, %v1446_v52  ;;  %1641 = vmatprep.subr.msk.bf16.mxu1 %vm249_vm4, %v1448_v53 }
 0x280   :  { %1471 = vmatpush1.bf16.msra.mxu0 %v1459_v38  ;;  %1512 = vmatpush1.bf16.msra.mxu1 %v1465_v54 }
 0x283   :  { %1640 = vmatmul.mubr.msk.bf16.vlgmr.msra.gmra.mrb[40].mxu0 %vm245_vm5, %v1444_v55  ;;  %1642 = vmatmul.mubr.msk.bf16.vlgmr.msra.gmra.mrb[40].mxu1 %vm245_vm5, %v1444_v55 }
 0x356   :  { %v1504_v57 = vpop.f32.mrb[40].mxu0  ;;  %v1545_v58 = vpop.f32.mrb[40].mxu1 }
 0x357   :  { %v1505_v34 = vadd.f32 %v1504_v57, %v1453_v56  ;;  %v1546_v59 = vadd.f32 %v1545_v58, %v1453_v56  ;;  %v1506_v60 = vpop.f32.mrb[41].mxu0  ;;  %v1547_v61 = vpop.f32.mrb[41].mxu1 }
 0x358   :  { %v1507_v62 = vadd.f32 %v1506_v60, %v1453_v56  ;;  %v1548_v63 = vadd.f32 %v1547_v61, %v1453_v56  ;;  %v1508_v0 = vpop.f32.mrb[42].mxu0  ;;  %v1549_v1 = vpop.f32.mrb[42].mxu1 }
 0x359   :  { %v1552_v2 = vmax.f32 %v1505_v34, 0.0  ;;  %v1554_v3 = vmax.f32 %v1546_v59, 0.0  ;;  %v1509_v4 = vpop.f32.mrb[43].mxu0  ;;  %v1550_v5 = vpop.f32.mrb[43].mxu1 }
 0x35a   :  { %v1553_v7 = vmax.f32 %v1507_v62, 0.0  ;;  %v1555_v8 = vmax.f32 %v1548_v63, 0.0 }
 0x35c   :  { %v1560_v9 = vcombine.low %v1552_v2, %v1553_v7  ;;  %v1561_v10 = vcombine.low %v1554_v3, %v1555_v8 }
 0x35e   :  { %v1564_v12 = vadd.f32 %v1657_v11, %v1560_v9  ;;  %v1565_v14 = vadd.f32 %v1658_v13, %v1561_v10 }
 0x360   :  { %v1566_v15 = vmax.f32 %v1564_v12, 0.0  ;;  %v1567_v16 = vmax.f32 %v1565_v14, 0.0 }
 0x362   :  { %1568 = vst [vmem:[#allocation2] sm:$0xff] %v1566_v15  ;;  %1569 = vst [vmem:[#allocation2 + $0x8] sm:$0xff] %v1567_v16 }
 0x363   :  { %1670 = shalt.err (!%p1667_p4)
}
 0x364   :  { %s1671_s13 = scalar_lea.hbm %s2078_s8, 256 }
 0x365   :  { %p1672_p5 = scmp.ne.s32.totalorder %s2078_s8, %s1671_s13  ;;  %p1675_p6 = scmp.lt.u32.totalorder %s1671_s13, %s2078_s8 }
 0x367   :  { %p1677_p7 = pnand %p1675_p6, %p1672_p5 }
 0x369   :  { %1680 = shalt.err (!%p1677_p7)
}
 0x36a   :  { %1579 = dma.vmem_to_hbm [thread:$0]  %s1577_s29, 256, %s2078_s8, [#allocation3]  }
 0x36b   :  { %1681 = dma.done.wait [#allocation3], 256  }
 0x36c   :  { %1682 = vsyncadd [#allocation3], 4294967040 }
 0x36d   :  { %1583 = vsyncpa [#allocation3], 1 }

</bundles_post_ra>
